<compile_context>
chip_gen: v7x
topology: tpu7x:2x2x1
jax: 0.10.0
libtpu: 0.0.40
codegen_flags: <defaults>
</compile_context>

<pallas_src>
import functools

import jax
import jax.numpy as jnp
from jax import lax
from jax.experimental import pallas as pl
from jax.experimental.pallas import tpu as pltpu


def _upconv_kernel(x_ref, w1_ref, b1_ref, w2_ref, b2_ref, o_ref, *, img_rows, roll_prev):
    """One batch tile (B_tile images folded into M = B_tile*img_rows rows) per grid step.

    x_ref : (M, (W+2)*Cin)             bf16  width-padded input rows
    w1_ref: (3, (W+2)*Cin, (W+2)*Cout) bf16  conv1 width-banded weights, one per kh tap
                                             (pad output columns are exactly zero)
    b1_ref: (1, (W+2)*Cout)            f32   conv1 bias (zero on pad columns)
    w2_ref: (3, (W+2)*Cout, W*Cout)    bf16  conv2 width-banded weights, one per kh tap
    b2_ref: (1, W*Cout)                f32
    o_ref : (M, W*Cout)                f32   lane-dense output slab
    """
    f32 = jnp.float32
    m = x_ref.shape[0]

    # Row index within each image of the fold.  Used to zero the kh-tap contributions
    # that would otherwise wrap across image boundaries (this *is* the zero row padding).
    row = lax.broadcasted_iota(jnp.int32, (m, 1), 0) % img_rows
    not_first = row != 0
    not_last = row != img_rows - 1

    def _shift(v, s):
        # result[i] = v[i - s]; rows that wrap are masked out by the callers below.
        if roll_prev is None:
            return jnp.roll(v, s, axis=0)                   # slice+concat fallback
        return pltpu.roll(v, (s * roll_prev) % m, axis=0)   # XLU rotate (free-ish slot)

    def tap_above(v):   # contribution of image row r-1; zero at each image's first row
        return jnp.where(not_first, _shift(v, 1), 0.0)

    def tap_below(v):   # contribution of image row r+1; zero at each image's last row
        return jnp.where(not_last, _shift(v, -1), 0.0)

    # ---- conv1: three accumulating banded matmuls (one per kh tap), f32 accumulation ----
    x = x_ref[...]
    r0 = jnp.dot(x, w1_ref[0], preferred_element_type=f32)
    r1 = jnp.dot(x, w1_ref[1], preferred_element_type=f32)
    r2 = jnp.dot(x, w1_ref[2], preferred_element_type=f32)
    y1 = jnp.maximum(tap_above(r0) + r1 + tap_below(r2) + b1_ref[...], 0.0)
    # Width-pad columns of y1 stay exactly 0 (zero band pad cols, zero bias pad entries,
    # ReLU(0)=0) -- conv2's band relies on this "born padded" width halo.
    y1 = y1.astype(jnp.bfloat16)          # single bf16 cast of the intermediate

    # ---- conv2: same structure, lane-dense N = W*Cout ----
    p0 = jnp.dot(y1, w2_ref[0], preferred_element_type=f32)
    p1 = jnp.dot(y1, w2_ref[1], preferred_element_type=f32)
    p2 = jnp.dot(y1, w2_ref[2], preferred_element_type=f32)
    o_ref[...] = tap_above(p0) + p1 + tap_below(p2) + b2_ref[...]


def _banded_weights(w_hwio, W, pad_out):
    """Width-folded block-banded weights for a 3x3 conv with padding=1.

    w_hwio: (3, 3, Ci, Co) float32.
    Returns (3, (W+2)*Ci, cols*Co) with cols = W+2 if pad_out (output keeps zero
    left/right pad columns -> intermediate is "born padded" in width), else cols = W
    (lane-dense output).
    """
    _, _, Ci, Co = w_hwio.shape
    Wp = W + 2
    cols = Wp if pad_out else W
    per_dh = []
    for dh in range(3):
        bw = jnp.zeros((Wp * Ci, cols * Co), jnp.float32)
        for dw in range(3):
            if pad_out:
                # sel[w_in, w_col] = 1 for w_col in 1..W and w_in = w_col - 1 + dw
                sel = jnp.eye(Wp, Wp, k=1 - dw, dtype=jnp.float32)
                sel = sel.at[:, 0].set(0.0).at[:, Wp - 1].set(0.0)
            else:
                # sel[w_in, w] = 1 for w in 0..W-1 and w_in = w + dw
                sel = jnp.eye(Wp, W, k=-dw, dtype=jnp.float32)
            bw = bw + jnp.kron(sel, w_hwio[dh, dw])
        per_dh.append(bw)
    return jnp.stack(per_dh)


@functools.lru_cache(maxsize=None)
def _resolve_roll_shift(m, n):
    """Shift s such that pltpu.roll(v, s, axis=0)[i] == v[i-1] on an (m, n) f32 array,
    probed once so the kernel never depends on a version-specific rotate direction.
    Returns None if the sublane rotate is unavailable (kernel then uses jnp.roll)."""
    def probe(x_ref, o_ref):
        o_ref[...] = pltpu.roll(x_ref[...], 1, axis=0)

    try:
        x = jnp.broadcast_to(jnp.arange(m, dtype=jnp.float32)[:, None], (m, n))
        y = pl.pallas_call(probe, out_shape=jax.ShapeDtypeStruct((m, n), jnp.float32))(x)
        first = int(y[1, 0])
    except Exception:
        return None
    if first == 0:
        return 1       # numpy convention: roll(+1) brings row i-1 to row i
    if first == 2:
        return -1      # flipped convention
    return None


def _pick_batch_tile(B, H, *, min_rows=64):
    """Batch-fold policy: give each grid step at least ~min_rows MXU rows (M = B_tile*H)
    when the batch allows, and once that is met keep >= 2 'parallel' grid steps so v7x's
    two TensorCores both get work.  Otherwise fold the whole batch into one step (small
    batches are launch-overhead bound)."""
    for d in range(1, B // 2 + 1):
        if B % d == 0 and (d * H) % 8 == 0 and d * H >= min_rows:
            return d
    return B   # single step; block dims == full array dims is always legal


def upconv_pallas(x_nchw, w1, b1, w2, b2):
    """x_nchw: (B, Cin, H, W); w1: (Cout, Cin, 3, 3); b1: (Cout,);
    w2: (Cout, Cout, 3, 3); b2: (Cout,).  Returns (B, Cout, H, W) float32."""
    B, Cin, H, W = x_nchw.shape
    Cout = w1.shape[0]
    Wp = W + 2

    # ---- wrapper-side layout plumbing (width pad only -> 1x input HBM traffic) ----
    x_nhwc = jnp.transpose(x_nchw, (0, 2, 3, 1)).astype(jnp.float32)
    x_wpad = jnp.pad(x_nhwc, ((0, 0), (0, 0), (1, 1), (0, 0)))          # (B, H, W+2, Cin)
    x2d = x_wpad.reshape(B * H, Wp * Cin).astype(jnp.bfloat16)

    w1_hwio = jnp.transpose(w1, (2, 3, 1, 0)).astype(jnp.float32)       # (3, 3, Cin, Cout)
    w2_hwio = jnp.transpose(w2, (2, 3, 1, 0)).astype(jnp.float32)       # (3, 3, Cout, Cout)
    w1_band = _banded_weights(w1_hwio, W, pad_out=True).astype(jnp.bfloat16)   # (3, Wp*Cin, Wp*Cout)
    w2_band = _banded_weights(w2_hwio, W, pad_out=False).astype(jnp.bfloat16)  # (3, Wp*Cout, W*Cout)

    b1_pad = jnp.concatenate(
        [jnp.zeros((Cout,), jnp.float32),
         jnp.tile(b1.astype(jnp.float32), W),
         jnp.zeros((Cout,), jnp.float32)]).reshape(1, Wp * Cout)
    b2_row = jnp.tile(b2.astype(jnp.float32), W).reshape(1, W * Cout)

    # ---- grid: fold batch into the matmul M dimension ----
    b_tile = _pick_batch_tile(B, H)
    n_steps = B // b_tile
    m_tile = b_tile * H

    kernel = functools.partial(
        _upconv_kernel, img_rows=H,
        roll_prev=_resolve_roll_shift(m_tile, Wp * Cout))

    flops = 6 * (B * H) * (Wp * Cout) * (Wp * Cin + W * Cout)
    bytes_accessed = (x2d.size * 2 + w1_band.size * 2 + w2_band.size * 2
                      + b1_pad.size * 4 + b2_row.size * 4 + B * H * W * Cout * 4)

    out2d = pl.pallas_call(
        kernel,
        out_shape=jax.ShapeDtypeStruct((B * H, W * Cout), jnp.float32),
        grid_spec=pltpu.PrefetchScalarGridSpec(
            num_scalar_prefetch=0,
            grid=(n_steps,),
            in_specs=[
                pl.BlockSpec((m_tile, Wp * Cin), lambda b: (b, 0)),
                # Grid-invariant operands: constant index_maps, so they are DMA'd once
                # (for production W, single-buffer these / tile W to bound VMEM).
                pl.BlockSpec((3, Wp * Cin, Wp * Cout), lambda b: (0, 0, 0)),
                pl.BlockSpec((1, Wp * Cout), lambda b: (0, 0)),
                pl.BlockSpec((3, Wp * Cout, W * Cout), lambda b: (0, 0, 0)),
                pl.BlockSpec((1, W * Cout), lambda b: (0, 0)),
            ],
            out_specs=pl.BlockSpec((m_tile, W * Cout), lambda b: (b, 0)),
        ),
        compiler_params=pltpu.CompilerParams(
            dimension_semantics=("parallel",),   # independent batch tiles -> both v7x TCs
            vmem_limit_bytes=32 * 1024 * 1024,
        ),
        cost_estimate=pl.CostEstimate(
            flops=flops, transcendentals=0, bytes_accessed=bytes_accessed),
    )(x2d, w1_band, b1_pad, w2_band, b2_row)

    # (B*H, W*Cout) -> (B, Cout, H, W).  A consumer that accepts the lane-dense
    # (B, H, W, C) layout (and/or bf16) could skip this transpose entirely.
    return jnp.transpose(out2d.reshape(B, H, W, Cout), (0, 3, 1, 2))


def upconv_reference(x_nchw, w1, b1, w2, b2, *, quantized=False):
    """Pure-JAX reference.  quantized=True mirrors the kernel's bf16 storage of
    activations / weights / intermediate (with f32 accumulation); quantized=False is the
    full-f32 PyTorch-module semantics."""
    def q(a):
        a = a.astype(jnp.float32)
        return a.astype(jnp.bfloat16).astype(jnp.float32) if quantized else a

    def conv3x3(x_nhwc, w_hwio, bias):
        H, W = x_nhwc.shape[1], x_nhwc.shape[2]
        xp = jnp.pad(x_nhwc, ((0, 0), (1, 1), (1, 1), (0, 0)))
        out = bias.astype(jnp.float32)
        for dh in range(3):
            for dw in range(3):
                out = out + jnp.einsum(
                    "bhwi,io->bhwo",
                    xp[:, dh:dh + H, dw:dw + W, :], w_hwio[dh, dw],
                    precision=jax.lax.Precision.HIGHEST)
        return out

    x = q(jnp.transpose(x_nchw, (0, 2, 3, 1)))
    w1h = q(jnp.transpose(w1, (2, 3, 1, 0)))
    w2h = q(jnp.transpose(w2, (2, 3, 1, 0)))
    y = jnp.maximum(conv3x3(x, w1h, b1), 0.0)
    y = q(y)
    y = conv3x3(y, w2h, b2)
    return jnp.transpose(y, (0, 3, 1, 2))


if __name__ == "__main__":
    # UpConv(in_channels=4, out_channels=8) on x of shape (2, 4, 16, 16).
    B, Cin, Cout, H, W = 2, 4, 8, 16, 16
    key = jax.random.PRNGKey(0)
    kx, k1, kb1, k2, kb2 = jax.random.split(key, 5)

    x = jax.random.normal(kx, (B, Cin, H, W), dtype=jnp.float32)
    # Deterministic synthetic parameters (not a checkpoint).
    w1 = jax.random.normal(k1, (Cout, Cin, 3, 3), dtype=jnp.float32) * 0.1
    b1 = jax.random.normal(kb1, (Cout,), dtype=jnp.float32) * 0.1
    w2 = jax.random.normal(k2, (Cout, Cout, 3, 3), dtype=jnp.float32) * 0.1
    b2 = jax.random.normal(kb2, (Cout,), dtype=jnp.float32) * 0.1

    out = jax.block_until_ready(upconv_pallas(x, w1, b1, w2, b2))
    assert out.shape == (B, Cout, H, W), out.shape

    # Tight check vs. a quantization-matched (bf16 storage, f32 accumulation) reference.
    ref_q = upconv_reference(x, w1, b1, w2, b2, quantized=True)
    assert jnp.allclose(out, ref_q, atol=2e-3, rtol=2e-3), (
        float(jnp.max(jnp.abs(out - ref_q))))

    # Loose sanity check vs. the full-float32 PyTorch-module semantics.
    ref_f32 = upconv_reference(x, w1, b1, w2, b2, quantized=False)
    assert jnp.allclose(out, ref_f32, atol=5e-2, rtol=5e-2), (
        float(jnp.max(jnp.abs(out - ref_f32))))

    print("KERNEL_OK")
</pallas_src>

<mosaic_0001>
module attributes {stable_mosaic.version = 11 : i64} {
  func.func @probe(%arg0: memref<32x144xf32, #tpu.memory_space<vmem>>, %arg1: memref<32x144xf32, #tpu.memory_space<vmem>>) attributes {dimension_semantics = [], scalar_prefetch = 0 : i64, scratch_operands = 0 : i64, tpu.core_type = #tpu.core_type<tc>} {
    %c0 = arith.constant 0 : index
    %c0_0 = arith.constant 0 : index
    %0 = vector.load %arg0[%c0, %c0_0] : memref<32x144xf32, #tpu.memory_space<vmem>>, vector<32x144xf32>
    %c1_i32 = arith.constant 1 : i32
    %1 = tpu.dynamic_rotate %0 by %c1_i32 dim 0 : vector<32x144xf32>, i32 -> vector<32x144xf32>
    %c0_1 = arith.constant 0 : index
    %c0_2 = arith.constant 0 : index
    %2 = vector.load %arg1[%c0_1, %c0_2] : memref<32x144xf32, #tpu.memory_space<vmem>>, vector<32x144xf32>
    tpu.vector_store %arg1[%c0_1, %c0_2], %1 {strides = array<i32>} : memref<32x144xf32, #tpu.memory_space<vmem>>, vector<32x144xf32>,
    return
  }
}

module attributes {stable_mosaic.version = 11 : i64} {
  func.func @_upconv_kernel(%arg0: i32, %arg1: memref<32x72xbf16, #tpu.memory_space<vmem>>, %arg2: memref<3x72x144xbf16, #tpu.memory_space<vmem>>, %arg3: memref<1x144xf32, #tpu.memory_space<vmem>>, %arg4: memref<3x144x128xbf16, #tpu.memory_space<vmem>>, %arg5: memref<1x128xf32, #tpu.memory_space<vmem>>, %arg6: memref<32x128xf32, #tpu.memory_space<vmem>>) attributes {dimension_semantics = [#tpu.dimension_semantics<parallel>], iteration_bounds = array<i64: 1>, scalar_prefetch = 0 : i64, scratch_operands = 0 : i64, tpu.core_type = #tpu.core_type<tc>, window_params = [{transform_indices = @transform_0, window_bounds = array<i64: 32, 72>}, {pipeline_mode = #tpu.pipeline_mode<synchronous>, transform_indices = @transform_1, window_bounds = array<i64: 3, 72, 144>}, {pipeline_mode = #tpu.pipeline_mode<synchronous>, transform_indices = @transform_2, window_bounds = array<i64: 1, 144>}, {pipeline_mode = #tpu.pipeline_mode<synchronous>, transform_indices = @transform_3, window_bounds = array<i64: 3, 144, 128>}, {pipeline_mode = #tpu.pipeline_mode<synchronous>, transform_indices = @transform_4, window_bounds = array<i64: 1, 128>}, {transform_indices = @transform_5, window_bounds = array<i64: 32, 128>}]} {
    %0 = tpu.iota {dimensions = array<i32: 0>} : vector<32x1xi32>
    %c16_i32 = arith.constant 16 : i32
    %c0_i32 = arith.constant 0 : i32
    %1 = arith.cmpi eq, %c16_i32, %c0_i32 : i32
    %c1_i32 = arith.constant 1 : i32
    %2 = arith.select %1, %c1_i32, %c16_i32 : i32
    %3 = vector.broadcast %2 : i32 to vector<32x1xi32>
    %4 = arith.remsi %0, %3 : vector<32x1xi32>
    %c0_i32_0 = arith.constant 0 : i32
    %5 = vector.broadcast %c0_i32_0 : i32 to vector<32x1xi32>
    %6 = arith.cmpi ne, %4, %5 : vector<32x1xi32>
    %c0_i32_1 = arith.constant 0 : i32
    %7 = vector.broadcast %c0_i32_1 : i32 to vector<32x1xi32>
    %8 = arith.cmpi slt, %4, %7 : vector<32x1xi32>
    %c0_i32_2 = arith.constant 0 : i32
    %9 = arith.cmpi slt, %2, %c0_i32_2 : i32
    %10 = vector.broadcast %9 : i1 to vector<32x1xi1>
    %11 = vector.broadcast %10 : vector<32x1xi1> to vector<32x1xi1>
    %12 = arith.xori %8, %11 : vector<32x1xi1>
    %13 = arith.andi %12, %6 : vector<32x1xi1>
    %14 = vector.broadcast %2 : i32 to vector<32x1xi32>
    %15 = arith.addi %4, %14 : vector<32x1xi32>
    %16 = arith.select %13, %15, %4 : vector<32x1xi1>, vector<32x1xi32>
    %c0_i32_3 = arith.constant 0 : i32
    %17 = vector.broadcast %c0_i32_3 : i32 to vector<32x1xi32>
    %18 = arith.cmpi ne, %16, %17 : vector<32x1xi32>
    %c15_i32 = arith.constant 15 : i32
    %19 = vector.broadcast %c15_i32 : i32 to vector<32x1xi32>
    %20 = arith.cmpi ne, %16, %19 : vector<32x1xi32>
    %c0 = arith.constant 0 : index
    %c0_4 = arith.constant 0 : index
    %21 = vector.load %arg1[%c0, %c0_4] : memref<32x72xbf16, #tpu.memory_space<vmem>>, vector<32x72xbf16>
    %c0_5 = arith.constant 0 : index
    %c0_6 = arith.constant 0 : index
    %c0_7 = arith.constant 0 : index
    %22 = vector.load %arg2[%c0_5, %c0_6, %c0_7] : memref<3x72x144xbf16, #tpu.memory_space<vmem>>, vector<1x72x144xbf16>
    %23 = vector.shape_cast %22 : vector<1x72x144xbf16> to vector<72x144xbf16>
    %cst = arith.constant dense<0.000000e+00> : vector<32x144xf32>
    %24 = tpu.matmul %21, %23, %cst {dimension_numbers = #tpu.dot_dimension_numbers<[1], [0], [0], [1], [0, 0, 1, 1], [], []>} : vector<32x72xbf16>, vector<72x144xbf16>, vector<32x144xf32> -> vector<32x144xf32>
    %c1 = arith.constant 1 : index
    %c0_8 = arith.constant 0 : index
    %c0_9 = arith.constant 0 : index
    %25 = vector.load %arg2[%c1, %c0_8, %c0_9] : memref<3x72x144xbf16, #tpu.memory_space<vmem>>, vector<1x72x144xbf16>
    %26 = vector.shape_cast %25 : vector<1x72x144xbf16> to vector<72x144xbf16>
    %cst_10 = arith.constant dense<0.000000e+00> : vector<32x144xf32>
    %27 = tpu.matmul %21, %26, %cst_10 {dimension_numbers = #tpu.dot_dimension_numbers<[1], [0], [0], [1], [0, 0, 1, 1], [], []>} : vector<32x72xbf16>, vector<72x144xbf16>, vector<32x144xf32> -> vector<32x144xf32>
    %c2 = arith.constant 2 : index
    %c0_11 = arith.constant 0 : index
    %c0_12 = arith.constant 0 : index
    %28 = vector.load %arg2[%c2, %c0_11, %c0_12] : memref<3x72x144xbf16, #tpu.memory_space<vmem>>, vector<1x72x144xbf16>
    %29 = vector.shape_cast %28 : vector<1x72x144xbf16> to vector<72x144xbf16>
    %cst_13 = arith.constant dense<0.000000e+00> : vector<32x144xf32>
    %30 = tpu.matmul %21, %29, %cst_13 {dimension_numbers = #tpu.dot_dimension_numbers<[1], [0], [0], [1], [0, 0, 1, 1], [], []>} : vector<32x72xbf16>, vector<72x144xbf16>, vector<32x144xf32> -> vector<32x144xf32>
    %31 = vector.extract_strided_slice %24 {offsets = [31, 0], sizes = [1, 144], strides = [1, 1]} : vector<32x144xf32> to vector<1x144xf32>
    %32 = vector.extract_strided_slice %24 {offsets = [0, 0], sizes = [31, 144], strides = [1, 1]} : vector<32x144xf32> to vector<31x144xf32>
    %33 = tpu.concatenate %31, %32 in 0 : vector<1x144xf32>, vector<31x144xf32> -> vector<32x144xf32>
    %cst_14 = arith.constant 0.000000e+00 : f32
    %34 = vector.shape_cast %18 : vector<32x1xi1> to vector<32x1xi1>
    %35 = vector.broadcast %34 : vector<32x1xi1> to vector<32x144xi1>
    %36 = vector.broadcast %cst_14 : f32 to vector<32x144xf32>
    %37 = arith.select %35, %33, %36 : vector<32x144xi1>, vector<32x144xf32>
    %38 = arith.addf %37, %27 : vector<32x144xf32>
    %39 = vector.extract_strided_slice %30 {offsets = [1, 0], sizes = [31, 144], strides = [1, 1]} : vector<32x144xf32> to vector<31x144xf32>
    %40 = vector.extract_strided_slice %30 {offsets = [0, 0], sizes = [1, 144], strides = [1, 1]} : vector<32x144xf32> to vector<1x144xf32>
    %41 = tpu.concatenate %39, %40 in 0 : vector<31x144xf32>, vector<1x144xf32> -> vector<32x144xf32>
    %cst_15 = arith.constant 0.000000e+00 : f32
    %42 = vector.shape_cast %20 : vector<32x1xi1> to vector<32x1xi1>
    %43 = vector.broadcast %42 : vector<32x1xi1> to vector<32x144xi1>
    %44 = vector.broadcast %cst_15 : f32 to vector<32x144xf32>
    %45 = arith.select %43, %41, %44 : vector<32x144xi1>, vector<32x144xf32>
    %46 = arith.addf %38, %45 : vector<32x144xf32>
    %c0_16 = arith.constant 0 : index
    %c0_17 = arith.constant 0 : index
    %47 = vector.load %arg3[%c0_16, %c0_17] : memref<1x144xf32, #tpu.memory_space<vmem>>, vector<1x144xf32>
    %48 = vector.broadcast %47 : vector<1x144xf32> to vector<32x144xf32>
    %49 = arith.addf %46, %48 : vector<32x144xf32>
    %cst_18 = arith.constant 0.000000e+00 : f32
    %50 = vector.broadcast %cst_18 : f32 to vector<32x144xf32>
    %51 = arith.maximumf %49, %50 : vector<32x144xf32>
    %52 = arith.truncf %51 : vector<32x144xf32> to vector<32x144xbf16>
    %c0_19 = arith.constant 0 : index
    %c0_20 = arith.constant 0 : index
    %c0_21 = arith.constant 0 : index
    %53 = vector.load %arg4[%c0_19, %c0_20, %c0_21] : memref<3x144x128xbf16, #tpu.memory_space<vmem>>, vector<1x144x128xbf16>
    %54 = vector.shape_cast %53 : vector<1x144x128xbf16> to vector<144x128xbf16>
    %cst_22 = arith.constant dense<0.000000e+00> : vector<32x128xf32>
    %55 = tpu.matmul %52, %54, %cst_22 {dimension_numbers = #tpu.dot_dimension_numbers<[1], [0], [0], [1], [0, 0, 1, 1], [], []>} : vector<32x144xbf16>, vector<144x128xbf16>, vector<32x128xf32> -> vector<32x128xf32>
    %c1_23 = arith.constant 1 : index
    %c0_24 = arith.constant 0 : index
    %c0_25 = arith.constant 0 : index
    %56 = vector.load %arg4[%c1_23, %c0_24, %c0_25] : memref<3x144x128xbf16, #tpu.memory_space<vmem>>, vector<1x144x128xbf16>
    %57 = vector.shape_cast %56 : vector<1x144x128xbf16> to vector<144x128xbf16>
    %cst_26 = arith.constant dense<0.000000e+00> : vector<32x128xf32>
    %58 = tpu.matmul %52, %57, %cst_26 {dimension_numbers = #tpu.dot_dimension_numbers<[1], [0], [0], [1], [0, 0, 1, 1], [], []>} : vector<32x144xbf16>, vector<144x128xbf16>, vector<32x128xf32> -> vector<32x128xf32>
    %c2_27 = arith.constant 2 : index
    %c0_28 = arith.constant 0 : index
    %c0_29 = arith.constant 0 : index
    %59 = vector.load %arg4[%c2_27, %c0_28, %c0_29] : memref<3x144x128xbf16, #tpu.memory_space<vmem>>, vector<1x144x128xbf16>
    %60 = vector.shape_cast %59 : vector<1x144x128xbf16> to vector<144x128xbf16>
    %cst_30 = arith.constant dense<0.000000e+00> : vector<32x128xf32>
    %61 = tpu.matmul %52, %60, %cst_30 {dimension_numbers = #tpu.dot_dimension_numbers<[1], [0], [0], [1], [0, 0, 1, 1], [], []>} : vector<32x144xbf16>, vector<144x128xbf16>, vector<32x128xf32> -> vector<32x128xf32>
    %62 = vector.extract_strided_slice %55 {offsets = [31, 0], sizes = [1, 128], strides = [1, 1]} : vector<32x128xf32> to vector<1x128xf32>
    %63 = vector.extract_strided_slice %55 {offsets = [0, 0], sizes = [31, 128], strides = [1, 1]} : vector<32x128xf32> to vector<31x128xf32>
    %64 = tpu.concatenate %62, %63 in 0 : vector<1x128xf32>, vector<31x128xf32> -> vector<32x128xf32>
    %cst_31 = arith.constant 0.000000e+00 : f32
    %65 = vector.shape_cast %18 : vector<32x1xi1> to vector<32x1xi1>
    %66 = vector.broadcast %65 : vector<32x1xi1> to vector<32x128xi1>
    %67 = vector.broadcast %cst_31 : f32 to vector<32x128xf32>
    %68 = arith.select %66, %64, %67 : vector<32x128xi1>, vector<32x128xf32>
    %69 = arith.addf %68, %58 : vector<32x128xf32>
    %70 = vector.extract_strided_slice %61 {offsets = [1, 0], sizes = [31, 128], strides = [1, 1]} : vector<32x128xf32> to vector<31x128xf32>
    %71 = vector.extract_strided_slice %61 {offsets = [0, 0], sizes = [1, 128], strides = [1, 1]} : vector<32x128xf32> to vector<1x128xf32>
    %72 = tpu.concatenate %70, %71 in 0 : vector<31x128xf32>, vector<1x128xf32> -> vector<32x128xf32>
    %cst_32 = arith.constant 0.000000e+00 : f32
    %73 = vector.shape_cast %20 : vector<32x1xi1> to vector<32x1xi1>
    %74 = vector.broadcast %73 : vector<32x1xi1> to vector<32x128xi1>
    %75 = vector.broadcast %cst_32 : f32 to vector<32x128xf32>
    %76 = arith.select %74, %72, %75 : vector<32x128xi1>, vector<32x128xf32>
    %77 = arith.addf %69, %76 : vector<32x128xf32>
    %c0_33 = arith.constant 0 : index
    %c0_34 = arith.constant 0 : index
    %78 = vector.load %arg5[%c0_33, %c0_34] : memref<1x128xf32, #tpu.memory_space<vmem>>, vector<1x128xf32>
    %79 = vector.broadcast %78 : vector<1x128xf32> to vector<32x128xf32>
    %80 = arith.addf %77, %79 : vector<32x128xf32>
    %c0_35 = arith.constant 0 : index
    %c0_36 = arith.constant 0 : index
    %81 = vector.load %arg6[%c0_35, %c0_36] : memref<32x128xf32, #tpu.memory_space<vmem>>, vector<32x128xf32>
    tpu.vector_store %arg6[%c0_35, %c0_36], %80 {strides = array<i32>} : memref<32x128xf32, #tpu.memory_space<vmem>>, vector<32x128xf32>,
    return
  }
  func.func @transform_0(%arg0: i32) -> (i32, i32) {
    %c0_i32 = arith.constant 0 : i32
    %c0_i32_0 = arith.constant 0 : i32
    return %arg0, %c0_i32 : i32, i32
  }
  func.func @transform_1(%arg0: i32) -> (i32, i32, i32) {
    %c0_i32 = arith.constant 0 : i32
    %c0_i32_0 = arith.constant 0 : i32
    %c0_i32_1 = arith.constant 0 : i32
    %c0_i32_2 = arith.constant 0 : i32
    return %c0_i32, %c0_i32_0, %c0_i32_1 : i32, i32, i32
  }
  func.func @transform_2(%arg0: i32) -> (i32, i32) {
    %c0_i32 = arith.constant 0 : i32
    %c0_i32_0 = arith.constant 0 : i32
    %c0_i32_1 = arith.constant 0 : i32
    return %c0_i32, %c0_i32_0 : i32, i32
  }
  func.func @transform_3(%arg0: i32) -> (i32, i32, i32) {
    %c0_i32 = arith.constant 0 : i32
    %c0_i32_0 = arith.constant 0 : i32
    %c0_i32_1 = arith.constant 0 : i32
    %c0_i32_2 = arith.constant 0 : i32
    return %c0_i32, %c0_i32_0, %c0_i32_1 : i32, i32, i32
  }
  func.func @transform_4(%arg0: i32) -> (i32, i32) {
    %c0_i32 = arith.constant 0 : i32
    %c0_i32_0 = arith.constant 0 : i32
    %c0_i32_1 = arith.constant 0 : i32
    return %c0_i32, %c0_i32_0 : i32, i32
  }
  func.func @transform_5(%arg0: i32) -> (i32, i32) {
    %c0_i32 = arith.constant 0 : i32
    %c0_i32_0 = arith.constant 0 : i32
    return %arg0, %c0_i32 : i32, i32
  }
}

</mosaic_0001>

<bundles_post_ra>
// kernel: tpu_custom_call.1
= control target key start
LH: loop header
LB: loop body
LE: loop exit
PB: predicated region body
PF: predicated region fallthrough
CT: control target
= control target key end

     0   :  { %6 = vsyncpa [#allocation3], 0  ;;  %s184_s0 = inlined_call_operand.hbm [shape: f32[32,144], index: 0, kind: input, shape index: {}]   ;;  %s185_s1 = inlined_call_operand.hbm [shape: f32[32,144], index: 1, kind: output, shape index: {}]  }
   0x1   :  { %7 = vsyncpa [#allocation4], 0  ;;  %s128_s6 = smov [#allocation2]   ;;  %s80_s10 = scalar_lea.hbm %s184_s0, 1024 }
   0x2   :  { %s13_s7 = sshll.u32 %s128_s6, 4  ;;  %p81_p0 = scmp.ne.s32.totalorder %s184_s0, %s80_s10  ;;  %s14_s7 = int_to_ptr.vmem [resolvable:$true] %s13_s7 }
   0x3   :  { %p84_p1 = scmp.lt.u32.totalorder %s80_s10, %s184_s0 }
   0x5   :  { %p86_p2 = pnand %p84_p1, %p81_p0 }
   0x7   :  { %89 = shalt.err (!%p86_p2)
}
   0x8   :  { %s90_s15 = scalar_lea.vmem %s14_s7, 1024  ;;  %p95_p4 = scmp.lt.s32.totalorder %s14_s7, %s14_s7 }
   0x9   :  { %p91_p3 = scmp.ne.s32.totalorder %s14_s7, %s90_s15  ;;  %p96_p5 = scmp.lt.s32.totalorder %s90_s15, %s90_s15 }
   0xb   :  { %p97_p6 = por %p96_p5, %p95_p4 }
   0xd   :  { %p98_p7 = pnand %p97_p6, %p91_p3 }
   0xf   :  { %101 = shalt.err (!%p98_p7)
}
  0x10   :  { %s129_s16 = smov 256   ;;  %s130_s17 = smov 16  }
  0x11   :  { %19 = dma.hbm_to_vmem [thread:$0]  %s184_s0, 1024, %s14_s7, [#allocation3], %s129_s16, %s129_s16, %s130_s17  }
  0x12   :  { %124 = dma.done.wait [#allocation3], 1024  }
  0x13   :  { %125 = vsyncadd [#allocation3], 4294966272  ;;  %v39_v0 = vlaneseq  ;;  %v23_v2 = vld [vmem:[#allocation2] sm:$0xff]  ;;  %v29_v3 = vld [vmem:[#allocation2 + $0x30] sm:$0xff]  ;;  %s131_s20 = smov [#allocation5]   ;;  %vm51_vm1 = vcmask 130048  }
  0x14   :  { %v24_v4 = vld [vmem:[#allocation2 + $0x8] sm:$0xff]  ;;  %s64_s21 = sshll.u32 %s131_s20, 4  ;;  %v31_v5 = vrot.slane %v23_v2, 7  ;;  %v37_v6 = vrot.slane %v29_v3, 7  ;;  %v30_v7 = vld [vmem:[#allocation2 + $0x38] sm:$0xff]  ;;  %v25_v9 = vld [vmem:[#allocation2 + $0x10] sm:$0xff]  ;;  %s65_s21 = int_to_ptr.vmem [resolvable:$true] %s64_s21 }
  0x15   :  { %v40_v1 = vshrl.u32 %v39_v0, 7  ;;  %v32_v8 = vrot.slane %v24_v4, 7  ;;  %v26_v10 = vld [vmem:[#allocation2 + $0x18] sm:$0xff]  ;;  %v38_v11 = vrot.slane %v30_v7, 7  ;;  %v33_v12 = vrot.slane %v25_v9, 7  ;;  %v27_v14 = vld [vmem:[#allocation2 + $0x20] sm:$0xff]  ;;  %p107_p9 = scmp.lt.s32.totalorder %s65_s21, %s65_s21 }
  0x16   :  { %v34_v13 = vrot.slane %v26_v10, 7  ;;  %v28_v15 = vld [vmem:[#allocation2 + $0x28] sm:$0xff]  ;;  %v35_v17 = vrot.slane %v27_v14, 7  ;;  %s102_s0 = scalar_lea.vmem %s65_s21, 1024 }
  0x17   :  { %vm41_vm0 = vcmp.lt.s32.totalorder %v40_v1, 1  ;;  %v36_v18 = vrot.slane %v28_v15, 7  ;;  %p103_p8 = scmp.ne.s32.totalorder %s65_s21, %s102_s0  ;;  %p108_p10 = scmp.lt.s32.totalorder %s102_s0, %s102_s0 }
  0x18   :  { %v48_v16 = vsel %vm41_vm0, %v37_v6, %v31_v5  ;;  %v49_v19 = vsel %vm41_vm0, %v38_v11, %v32_v8  ;;  %v46_v20 = vsel %vm41_vm0, %v31_v5, %v33_v12  ;;  %v47_v21 = vsel %vm41_vm0, %v32_v8, %v34_v13 }
  0x19   :  { %50 = vst [vmem:[#allocation5] sm:$0xff] %v48_v16  ;;  %52 = vst.msk [vmem:[#allocation5 + $0x8] sm:$0xff] %vm51_vm1, %v49_v19  ;;  %v44_v22 = vsel %vm41_vm0, %v33_v12, %v35_v17  ;;  %v45_v23 = vsel %vm41_vm0, %v34_v13, %v36_v18  ;;  %v42_v24 = vsel %vm41_vm0, %v35_v17, %v37_v6  ;;  %p109_p11 = por %p108_p10, %p107_p9 }
  0x1a   :  { %53 = vst [vmem:[#allocation5 + $0x10] sm:$0xff] %v46_v20  ;;  %54 = vst.msk [vmem:[#allocation5 + $0x18] sm:$0xff] %vm51_vm1, %v47_v21  ;;  %v43_v25 = vsel %vm41_vm0, %v36_v18, %v38_v11 }
  0x1b   :  { %55 = vst [vmem:[#allocation5 + $0x20] sm:$0xff] %v44_v22  ;;  %56 = vst.msk [vmem:[#allocation5 + $0x28] sm:$0xff] %vm51_vm1, %v45_v23  ;;  %p110_p12 = pnand %p109_p11, %p103_p8 }
  0x1c   :  { %57 = vst [vmem:[#allocation5 + $0x30] sm:$0xff] %v42_v24  ;;  %58 = vst.msk [vmem:[#allocation5 + $0x38] sm:$0xff] %vm51_vm1, %v43_v25 }
  0x1d   :  { %113 = shalt.err (!%p110_p12)
}
  0x1e   :  { %s114_s24 = scalar_lea.hbm %s185_s1, 1024 }
  0x1f   :  { %p115_p13 = scmp.ne.s32.totalorder %s185_s1, %s114_s24  ;;  %p118_p0 = scmp.lt.u32.totalorder %s114_s24, %s185_s1 }
  0x21   :  { %p120_p1 = pnand %p118_p0, %p115_p13 }
  0x23   :  { %123 = shalt.err (!%p120_p1)
}
  0x24   :  { %70 = dma.vmem_to_hbm [thread:$0]  %s65_s21, 1024, %s185_s1, [#allocation4], %s129_s16, %s129_s16, %s130_s17  }
  0x25   :  { %126 = dma.done.wait [#allocation4], 1024  }
  0x26   :  { %127 = vsyncadd [#allocation4], 4294966272 }
  0x27   :  { %74 = vsyncpa [#allocation3], 1 }
  0x28   :  { %75 = vsyncpa [#allocation4], 1 }

// kernel: tpu_custom_call.1
= control target key start
LH: loop header
LB: loop body
LE: loop exit
PB: predicated region body
PF: predicated region fallthrough
CT: control target
= control target key end

     0   :  { %10 = vsyncpa [#allocation3], 0  ;;  %s1569_s0 = inlined_call_operand.hbm [shape: bf16[32,72], index: 0, kind: input, shape index: {}]   ;;  %s1570_s1 = inlined_call_operand.hbm [shape: bf16[3,72,144], index: 1, kind: input, shape index: {}]   ;;  %s1571_s2 = inlined_call_operand.vmem [shape: f32[1,144], index: 2, kind: input, shape index: {}]   ;;  %s1572_s3 = inlined_call_operand.hbm [shape: bf16[3,144,128], index: 3, kind: input, shape index: {}]   ;;  %s1573_s4 = inlined_call_operand.vmem [shape: f32[1,128], index: 4, kind: input, shape index: {}]   ;;  %s1574_s5 = inlined_call_operand.hbm [shape: f32[32,128], index: 5, kind: output, shape index: {}]  }
   0x1   :  { %11 = vsyncpa [#allocation6], 0 }
   0x2   :  { %12 = vsyncpa [#allocation4], 0  ;;  %s1341_s18 = smov [#allocation5]   ;;  %s1247_s22 = scalar_lea.hbm %s1570_s1, 3456 }
   0x3   :  { %s30_s19 = sshll.u32 %s1341_s18, 4  ;;  %p1248_p0 = scmp.ne.s32.totalorder %s1570_s1, %s1247_s22  ;;  %s31_s19 = int_to_ptr.vmem [resolvable:$true] %s30_s19 }
   0x4   :  { %p1251_p1 = scmp.lt.u32.totalorder %s1247_s22, %s1570_s1 }
   0x6   :  { %p1253_p2 = pnand %p1251_p1, %p1248_p0 }
   0x8   :  { %1256 = shalt.err (!%p1253_p2)
}
   0x9   :  { %s1257_s27 = scalar_lea.vmem %s31_s19, 3456  ;;  %p1262_p4 = scmp.lt.s32.totalorder %s31_s19, %s31_s19 }
   0xa   :  { %p1258_p3 = scmp.ne.s32.totalorder %s31_s19, %s1257_s27  ;;  %p1263_p5 = scmp.lt.s32.totalorder %s1257_s27, %s1257_s27 }
   0xc   :  { %p1264_p6 = por %p1263_p5, %p1262_p4 }
   0xe   :  { %p1265_p7 = pnand %p1264_p6, %p1258_p3 }
  0x10   :  { %1268 = shalt.err (!%p1265_p7)
}
  0x11   :  { %s1342_s28 = smov 128   ;;  %s1343_s29 = smov 8  }
  0x12   :  { %36 = dma.hbm_to_vmem [thread:$0]  %s1570_s1, 3456, %s31_s19, [#allocation6], %s1342_s28, %s1342_s28, %s1343_s29  }
  0x13   :  { %s1344_s7 = smov [#allocation2]   ;;  %s1269_s11 = scalar_lea.hbm %s1569_s0, 256 }
  0x14   :  { %s18_s8 = sshll.u32 %s1344_s7, 4  ;;  %p1270_p8 = scmp.ne.s32.totalorder %s1569_s0, %s1269_s11  ;;  %s19_s8 = int_to_ptr.vmem [resolvable:$true] %s18_s8 }
  0x15   :  { %p1273_p9 = scmp.lt.u32.totalorder %s1269_s11, %s1569_s0 }
  0x17   :  { %p1275_p10 = pnand %p1273_p9, %p1270_p8 }
  0x19   :  { %1278 = shalt.err (!%p1275_p10)
}
  0x1a   :  { %s1279_s16 = scalar_lea.vmem %s19_s8, 256  ;;  %p1284_p12 = scmp.lt.s32.totalorder %s19_s8, %s19_s8 }
  0x1b   :  { %p1280_p11 = scmp.ne.s32.totalorder %s19_s8, %s1279_s16  ;;  %p1285_p13 = scmp.lt.s32.totalorder %s1279_s16, %s1279_s16 }
  0x1d   :  { %p1286_p0 = por %p1285_p13, %p1284_p12 }
  0x1f   :  { %p1287_p1 = pnand %p1286_p0, %p1280_p11 }
  0x21   :  { %1290 = shalt.err (!%p1287_p1)
}
  0x22   :  { %s1345_s1 = smov 64   ;;  %s1346_s17 = smov 4  }
  0x23   :  { %24 = dma.hbm_to_vmem [thread:$0]  %s1569_s0, 256, %s19_s8, [#allocation3], %s1345_s1, %s1345_s1, %s1346_s17  }
  0x24   :  { %s1347_s20 = smov [#allocation7]   ;;  %s1291_s24 = scalar_lea.hbm %s1572_s3, 3456 }
  0x25   :  { %s44_s21 = sshll.u32 %s1347_s20, 4  ;;  %p1292_p2 = scmp.ne.s32.totalorder %s1572_s3, %s1291_s24  ;;  %s45_s21 = int_to_ptr.vmem [resolvable:$true] %s44_s21 }
  0x26   :  { %p1295_p3 = scmp.lt.u32.totalorder %s1291_s24, %s1572_s3 }
  0x28   :  { %p1297_p4 = pnand %p1295_p3, %p1292_p2 }
  0x2a   :  { %1300 = shalt.err (!%p1297_p4)
}
  0x2b   :  { %s1301_s6 = scalar_lea.vmem %s45_s21, 3456  ;;  %p1306_p6 = scmp.lt.s32.totalorder %s45_s21, %s45_s21 }
  0x2c   :  { %p1302_p5 = scmp.ne.s32.totalorder %s45_s21, %s1301_s6  ;;  %p1307_p7 = scmp.lt.s32.totalorder %s1301_s6, %s1301_s6 }
  0x2e   :  { %p1308_p8 = por %p1307_p7, %p1306_p6 }
  0x30   :  { %p1309_p9 = pnand %p1308_p8, %p1302_p5 }
  0x32   :  { %1312 = shalt.err (!%p1309_p9)
}
  0x33   :  { %50 = dma.hbm_to_vmem [thread:$0]  %s1572_s3, 3456, %s45_s21, [#allocation6], %s1345_s1, %s1345_s1, %s1346_s17  }
  0x34   :  { %1335 = dma.done.wait [#allocation3], 256  }
  0x35   :  { %1336 = vsyncadd [#allocation3], 4294967040 }
  0x36   :  { %1337 = dma.done.wait [#allocation6], 6912  }
  0x37   :  { %1338 = vsyncadd [#allocation6], 4294960384  ;;  %v1348_v0 = vmov 0   ;;  %v1176_v1 = vld [vmem:[#allocation5 + $0x4] ss:$8 sps:$4 sm:$0xff]   ;;  %vm199_vm0 = vcmask 1043456   ;;  %v63_v57 = vlaneseq }
  0x38   :  { %238 = vmatprep.mubr.bf16.mxu0 %v1348_v0  ;;  %352 = vmatprep.mubr.bf16.mxu1 %v1348_v0  ;;  %v1178_v2 = vld [vmem:[#allocation5] ss:$8 sps:$4 sm:$0xff]   ;;  %v1179_v3 = vld [vmem:[#allocation5 + $0x4c] ss:$8 sps:$4 sm:$0xff]   ;;  %v1184_v6 = vld [vmem:[#allocation5 + $0x10] ss:$8 sps:$4 sm:$0xff]  }
  0x39   :  { %206 = vmatprep.subr.bf16.mxu0 %v1176_v1  ;;  %v1181_v4 = vld [vmem:[#allocation5 + $0x14] ss:$8 sps:$4 sm:$0xff]   ;;  %v1183_v5 = vld [vmem:[#allocation5 + $0x48] ss:$8 sps:$4 sm:$0xff]   ;;  %320 = vmatprep.subr.bf16.mxu1 %v1179_v3  ;;  %v1187_v8 = vld [vmem:[#allocation5 + $0x24] ss:$8 sps:$4 sm:$0xff]  }
  0x3a   :  { %207 = vmatpush1.bf16.msra.mxu0 %v1178_v2  ;;  %v1185_v7 = vld [vmem:[#allocation5 + $0x5c] ss:$8 sps:$4 sm:$0xff]   ;;  %321 = vmatpush1.bf16.msra.mxu1 %v1183_v5  ;;  %v1189_v9 = vld [vmem:[#allocation5 + $0x58] ss:$8 sps:$4 sm:$0xff]   ;;  %v1191_v11 = vld [vmem:[#allocation5 + $0x6c] ss:$8 sps:$4 sm:$0xff]  }
  0x3b   :  { %208 = vmatprep.subr.bf16.mxu0 %v1181_v4  ;;  %322 = vmatprep.subr.bf16.mxu1 %v1185_v7  ;;  %v1190_v10 = vld [vmem:[#allocation5 + $0x20] ss:$8 sps:$4 sm:$0xff]   ;;  %v1193_v12 = vld [vmem:[#allocation5 + $0x34] ss:$8 sps:$4 sm:$0xff]   ;;  %v1196_v14 = vld [vmem:[#allocation5 + $0x30] ss:$8 sps:$4 sm:$0xff]  }
  0x3c   :  { %v1195_v13 = vld [vmem:[#allocation5 + $0x68] ss:$8 sps:$4 sm:$0xff]   ;;  %v1197_v15 = vld [vmem:[#allocation5 + $0x7c] ss:$8 sps:$4 sm:$0xff]   ;;  %v1200_v20 = vld [vmem:[#allocation5 + $0x78] ss:$8 sps:$4 sm:$0xff]  }
  0x3d   :  { %v136_v16 = vld [vmem:[#allocation5 + $0x40] sm:$0xff]  ;;  %v268_v17 = vld [vmem:[#allocation5 + $0x88] sm:$0xff]  ;;  %v1207_v24 = vld [vmem:[#allocation5 + $0x94] ss:$8 sps:$4 sm:$0xff]   ;;  %vm192_vm1 = vcmask 588800   ;;  %v1456_v58 = vshrl.u32 %v63_v57, 7 }
  0x3e   :  { %209 = vmatpush1.bf16.msra.mxu0 %v1184_v6  ;;  %323 = vmatpush1.bf16.msra.mxu1 %v1189_v9  ;;  %v1103_v18 = vcombine.high %v136_v16, %v136_v16  ;;  %v1102_v19 = vcombine.low %v136_v16, %v136_v16  ;;  %v1116_v21 = vcombine.high %v268_v17, %v268_v17  ;;  %v1203_v25 = vld [vmem:[#allocation2] sm:$0xff]   ;;  %v1210_v28 = vld [vmem:[#allocation5 + $0xa4] ss:$8 sps:$4 sm:$0xff]   ;;  %v1208_v31 = vld [vmem:[#allocation5 + $0xa0] ss:$8 sps:$4 sm:$0xff]   ;;  %vm499_vm2 = vcmask 1040384  }
  0x3f   :  { %210 = vmatprep.subr.bf16.mxu0 %v1187_v8  ;;  %324 = vmatprep.subr.bf16.mxu1 %v1191_v11  ;;  %v1115_v22 = vcombine.low %v268_v17, %v268_v17  ;;  %v1205_v27 = vld [vmem:[#allocation5 + $0x90] ss:$8 sps:$4 sm:$0xff]   ;;  %v1214_v33 = vld [vmem:[#allocation5 + $0xb4] ss:$8 sps:$4 sm:$0xff]   ;;  %v1217_v36 = vld [vmem:[#allocation5 + $0xc4] ss:$8 sps:$4 sm:$0xff]  }
  0x40   :  { %v201_v23 = vsel %vm199_vm0, %v1102_v19, 0  ;;  %v382_v29 = vld [vmem:[#allocation5 + $0xd0] sm:$0xff]  ;;  %v1211_v34 = vld [vmem:[#allocation2 + $0x8] sm:$0xff]   ;;  %v1215_v37 = vld [vmem:[#allocation5 + $0xc0] ss:$8 sps:$4 sm:$0xff]   ;;  %v66_v62 = vadd.s32 16, %v1456_v58 }
  0x41   :  { %v315_v26 = vsel %vm199_vm0, %v1115_v22, 0  ;;  %v1128_v30 = vcombine.low %v382_v29, %v382_v29  ;;  %v1212_v35 = vld [vmem:[#allocation5 + $0xb0] ss:$8 sps:$4 sm:$0xff]   ;;  %v1129_v38 = vcombine.high %v382_v29, %v382_v29  ;;  %v1221_v40 = vld [vmem:[#allocation7 + $0x48] sm:$0xff]   ;;  %v1223_v42 = vld [vmem:[#allocation7 + $0x50] sm:$0xff]   ;;  %vm554_vm5 = vcmask 1046528  }
  0x42   :  { %211 = vmatpush1.bf16.msra.mxu0 %v1190_v10  ;;  %325 = vmatpush1.bf16.msra.mxu1 %v1195_v13  ;;  %v1220_v39 = vld [vmem:[#allocation7] sm:$0xff]   ;;  %v1222_v41 = vld [vmem:[#allocation7 + $0x8] sm:$0xff]   ;;  %v1224_v43 = vld [vmem:[#allocation7 + $0x10] sm:$0xff]   ;;  %v86_v10 = vand.u32 15, %v66_v62  ;;  %v613_v57 = vsub.s32 1, %v1456_v58  ;;  %vm709_vm8 = vcmask 130048  }
  0x43   :  { %212 = vmatprep.subr.bf16.mxu0 %v1193_v12  ;;  %326 = vmatprep.subr.bf16.mxu1 %v1197_v15  ;;  %v429_v32 = vsel %vm199_vm0, %v1128_v30, 0  ;;  %v1225_v44 = vld [vmem:[#allocation7 + $0x58] sm:$0xff]   ;;  %v1227_v46 = vld [vmem:[#allocation7 + $0x60] sm:$0xff]   ;;  %v1229_v48 = vld [vmem:[#allocation7 + $0x68] sm:$0xff]  }
  0x44   :  { %v1226_v45 = vld [vmem:[#allocation7 + $0x18] sm:$0xff]   ;;  %v1228_v47 = vld [vmem:[#allocation7 + $0x20] sm:$0xff]   ;;  %v1230_v49 = vld [vmem:[#allocation7 + $0x28] sm:$0xff]   ;;  %vm1466_vm3 = vcmp.ne.s32.totalorder %v86_v10, 0 }
  0x45   :  { %v1231_v50 = vld [vmem:[#allocation7 + $0x70] sm:$0xff]   ;;  %v1233_v52 = vld [vmem:[#allocation7 + $0x78] sm:$0xff]   ;;  %v1235_v54 = vld [vmem:[#allocation7 + $0x80] sm:$0xff]  }
  0x46   :  { %213 = vmatpush1.bf16.msra.mxu0 %v1196_v14  ;;  %327 = vmatpush1.bf16.msra.mxu1 %v1200_v20  ;;  %v1232_v51 = vld [vmem:[#allocation7 + $0x30] sm:$0xff]   ;;  %v1234_v53 = vld [vmem:[#allocation7 + $0x38] sm:$0xff]   ;;  %v1236_v55 = vld [vmem:[#allocation7 + $0x40] sm:$0xff]   ;;  %v72_v14 = vand.u32 15, %v1456_v58 }
  0x47   :  { %1104 = vmatprep.subr.msk.bf16.mxu0 %vm199_vm0, %v1103_v18  ;;  %1117 = vmatprep.subr.msk.bf16.mxu1 %vm199_vm0, %v1116_v21  ;;  %v1237_v56 = vld [vmem:[#allocation7 + $0x88] sm:$0xff]   ;;  %v1166_v18 = vld [vmem:[%s1573_s4] ss:$0 sm:$0xff]  ;;  %s1349_s4 = smov [#allocation8]  }
  0x48   :  { %vm1470_vm4 = vcmp.ne.s32.totalorder %v72_v14, 0  ;;  %s1079_s10 = sshll.u32 %s1349_s4, 4  ;;  %s1080_s10 = int_to_ptr.vmem [resolvable:$true] %s1079_s10 }
  0x49   :  { %s1313_s11 = scalar_lea.vmem %s1080_s10, 512  ;;  %p1318_p11 = scmp.lt.s32.totalorder %s1080_s10, %s1080_s10 }
  0x4a   :  { %215 = vmatpush1.bf16.msra.mxu0 %v201_v23  ;;  %329 = vmatpush1.bf16.msra.mxu1 %v315_v26  ;;  %p1314_p10 = scmp.ne.s32.totalorder %s1080_s10, %s1313_s11  ;;  %p1319_p12 = scmp.lt.s32.totalorder %s1313_s11, %s1313_s11 }
  0x4b   :  { %434 = vmatprep.subr.bf16.mxu0 %v1207_v24  ;;  %716 = vmatprep.subr.bf16.mxu1 %v1348_v0 }
  0x4c   :  { %p1320_p13 = por %p1319_p12, %p1318_p11 }
  0x4d   :  { %1105 = vmatmul.mubr.msk.bf16.vlgmr.msra.gmra.mrb[0].mxu0 %vm192_vm1, %v1203_v25  ;;  %1118 = vmatmul.mubr.msk.bf16.vlgmr.msra.gmra.mrb[0].mxu1 %vm192_vm1, %v1203_v25 }
  0x4e   :  { %435 = vmatpush1.bf16.msra.mxu0 %v1205_v27  ;;  %248 = vmatprep.mubr.bf16.mxu0 %v1348_v0  ;;  %p1321_p0 = pnand %p1320_p13, %p1314_p10 }
  0x4f   :  { %436 = vmatprep.subr.bf16.mxu0 %v1210_v28  ;;  %362 = vmatprep.mubr.bf16.mxu1 %v1348_v0 }
  0x50   :  { %717 = vmatpush1.bf16.msra.mxu1 %v1220_v39 }
  0x51   :  { %718 = vmatprep.subr.bf16.mxu1 %v1348_v0 }
  0x52   :  { %437 = vmatpush1.bf16.msra.mxu0 %v1208_v31 }
  0x53   :  { %438 = vmatprep.subr.bf16.mxu0 %v1214_v33 }
  0x54   :  { %719 = vmatpush1.bf16.msra.mxu1 %v1222_v41 }
  0x55   :  { %1106 = vmatmul.mubr.msk.bf16.gmra.mrb[4].mxu0 %vm192_vm1, %v1211_v34  ;;  %1119 = vmatmul.mubr.msk.bf16.gmra.mrb[4].mxu1 %vm192_vm1, %v1211_v34 }
  0x56   :  { %439 = vmatpush1.bf16.msra.mxu0 %v1212_v35  ;;  %466 = vmatprep.mubr.bf16.mxu0 %v1348_v0 }
  0x57   :  { %440 = vmatprep.subr.bf16.mxu0 %v1217_v36  ;;  %720 = vmatprep.subr.bf16.mxu1 %v1348_v0 }
  0x58   :  { %721 = vmatpush1.bf16.msra.mxu1 %v1224_v43 }
  0x59   :  { %722 = vmatprep.subr.bf16.mxu1 %v1348_v0 }
  0x5a   :  { %441 = vmatpush1.bf16.msra.mxu0 %v1215_v37 }
  0x5b   :  { %1130 = vmatprep.subr.msk.bf16.mxu0 %vm199_vm0, %v1129_v38 }
  0x5c   :  { %723 = vmatpush1.bf16.msra.mxu1 %v1226_v45 }
  0x5d   :  { %724 = vmatprep.subr.bf16.mxu1 %v1348_v0 }
  0x5e   :  { %443 = vmatpush1.bf16.msra.mxu0 %v429_v32 }
  0x5f   :  { %838 = vmatprep.subr.bf16.mxu0 %v1348_v0 }
  0x60   :  { %725 = vmatpush1.bf16.msra.mxu1 %v1228_v47  ;;  %v65_v47 = vadd.s32 8, %v1456_v58 }
  0x61   :  { %1131 = vmatmul.mubr.msk.bf16.vlgmr.msra.gmra.mrb[8].mxu0 %vm192_vm1, %v1203_v25  ;;  %726 = vmatprep.subr.bf16.mxu1 %v1348_v0 }
  0x62   :  { %476 = vmatprep.mubr.bf16.mxu0 %v1348_v0  ;;  %839 = vmatpush1.bf16.msra.mxu0 %v1221_v40 }
  0x63   :  { %840 = vmatprep.subr.bf16.mxu0 %v1348_v0 }
  0x64   :  { %727 = vmatpush1.bf16.msra.mxu1 %v1230_v49 }
  0x65   :  { %728 = vmatprep.subr.bf16.mxu1 %v1348_v0 }
  0x66   :  { %841 = vmatpush1.bf16.msra.mxu0 %v1223_v42 }
  0x67   :  { %842 = vmatprep.subr.bf16.mxu0 %v1348_v0 }
  0x68   :  { %729 = vmatpush1.bf16.msra.mxu1 %v1232_v51  ;;  %v609_v51 = vsub.s32 0, %v1456_v58 }
  0x69   :  { %1132 = vmatmul.mubr.msk.bf16.gmra.mrb[12].mxu0 %vm192_vm1, %v1211_v34  ;;  %730 = vmatprep.subr.bf16.mxu1 %v1348_v0 }
  0x6a   :  { %843 = vmatpush1.bf16.msra.mxu0 %v1225_v44 }
  0x6b   :  { %844 = vmatprep.subr.bf16.mxu0 %v1348_v0 }
  0x6c   :  { %731 = vmatpush1.bf16.msra.mxu1 %v1234_v53  ;;  %v67_v53 = vadd.s32 24, %v1456_v58 }
  0x6d   :  { %732 = vmatprep.subr.bf16.mxu1 %v1348_v0 }
  0x6e   :  { %845 = vmatpush1.bf16.msra.mxu0 %v1227_v46 }
  0x6f   :  { %846 = vmatprep.subr.bf16.mxu0 %v1348_v0 }
  0x70   :  { %733 = vmatpush1.bf16.msra.mxu1 %v1236_v55  ;;  %v605_v55 = vld [vmem:[%s1571_s2] sm:$0x3] }
  0x71   :  { %960 = vmatprep.subr.bf16.mxu1 %v1348_v0 }
  0x72   :  { %847 = vmatpush1.bf16.msra.mxu0 %v1229_v48 }
  0x73   :  { %848 = vmatprep.subr.bf16.mxu0 %v1348_v0 }
  0x76   :  { %849 = vmatpush1.bf16.msra.mxu0 %v1231_v50 }
  0x77   :  { %850 = vmatprep.subr.bf16.mxu0 %v1348_v0 }
  0x7a   :  { %851 = vmatpush1.bf16.msra.mxu0 %v1233_v52 }
  0x7b   :  { %852 = vmatprep.subr.bf16.mxu0 %v1348_v0 }
  0x7e   :  { %853 = vmatpush1.bf16.msra.mxu0 %v1235_v54 }
  0x7f   :  { %854 = vmatprep.subr.bf16.mxu0 %v1348_v0 }
  0x82   :  { %855 = vmatpush1.bf16.msra.mxu0 %v1237_v56 }
 0x120   :  { %v240_v59 = vpop.f32.mrb[0].mxu0  ;;  %v354_v1 = vpop.f32.mrb[0].mxu1 }
 0x121   :  { %v500_v60 = vrot.slane %v240_v59, 7  ;;  %v242_v61 = vpop.f32.mrb[1].mxu0  ;;  %v356_v4 = vpop.f32.mrb[1].mxu1 }
 0x122   :  { %v244_v63 = vpop.f32.mrb[2].mxu0  ;;  %v501_v5 = vrot.slane %v242_v61, 7  ;;  %v358_v7 = vpop.f32.mrb[2].mxu1 }
 0x123   :  { %v502_v2 = vrot.slane %v244_v63, 7  ;;  %v246_v3 = vpop.f32.mrb[3].mxu0  ;;  %v360_v9 = vpop.f32.mrb[3].mxu1  ;;  %v610_v63 = vrot.slane %v605_v55, %v609_v51 }
 0x124   :  { %v504_v6 = vrot.slane %v246_v3, 7  ;;  %v614_v3 = vrot.slane %v605_v55, %v613_v57  ;;  %v1242_v55 = vld [vmem:[#allocation7 + $0xb0] sm:$0xff]   ;;  %v1244_v57 = vld [vmem:[#allocation7 + $0xc0] sm:$0xff]  }
 0x125   :  { %v503_v8 = vsel %vm499_vm2, %v500_v60, %v502_v2 }
 0x126   :  { %v1460_v11 = vadd.f32 %v503_v8, %v358_v7  ;;  %v505_v12 = vsel %vm499_vm2, %v501_v5, %v504_v6 }
 0x127   :  { %v1463_v13 = vadd.f32 %v505_v12, %v360_v9 }
 0x128   :  { %v250_v15 = vpop.f32.mrb[4].mxu0  ;;  %v364_v21 = vpop.f32.mrb[4].mxu1 }
 0x129   :  { %v506_v16 = vrot.slane %v250_v15, 7  ;;  %v252_v17 = vpop.f32.mrb[5].mxu0  ;;  %v366_v26 = vpop.f32.mrb[5].mxu1 }
 0x12a   :  { %v508_v19 = vrot.slane %v252_v17, 7  ;;  %v254_v20 = vpop.f32.mrb[6].mxu0  ;;  %v368_v30 = vpop.f32.mrb[6].mxu1 }
 0x12b   :  { %v489_v23 = vrot.slane %v254_v20, 7  ;;  %v256_v24 = vpop.f32.mrb[7].mxu0  ;;  %v507_v25 = vsel %vm499_vm2, %v502_v2, %v506_v16  ;;  %v370_v35 = vpop.f32.mrb[7].mxu1  ;;  %v93_v2 = vand.u32 15, %v67_v53  ;;  %v1240_v53 = vld [vmem:[#allocation7 + $0xa0] sm:$0xff]  }
 0x12c   :  { %v490_v27 = vrot.slane %v256_v24, 7  ;;  %v534_v28 = vsel %vm1466_vm3, %v507_v25, 0.0  ;;  %v509_v29 = vsel %vm499_vm2, %v504_v6, %v508_v19 }
 0x12d   :  { %v520_v31 = vsel %vm499_vm2, %v489_v23, %v500_v60  ;;  %v542_v32 = vadd.f32 %v534_v28, %v364_v21  ;;  %v535_v33 = vsel %vm1466_vm3, %v509_v29, 0.0  ;;  %v510_v34 = vsel %vm499_vm2, %v506_v16, %v489_v23 }
 0x12e   :  { %v530_v36 = vsel %vm1470_vm4, %v520_v31, 0.0  ;;  %v521_v37 = vsel %vm499_vm2, %v490_v27, %v501_v5  ;;  %v543_v38 = vadd.f32 %v535_v33, %v366_v26  ;;  %v544_v39 = vadd.f32 %v510_v34, %v368_v30 }
 0x12f   :  { %v538_v40 = vadd.f32 %v530_v36, %v354_v1  ;;  %v531_v41 = vsel %vm1470_vm4, %v521_v37, 0.0  ;;  %v511_v42 = vsel %vm499_vm2, %v508_v19, %v490_v27  ;;  %v79_v60 = vand.u32 15, %v65_v47 }
 0x130   :  { %v539_v43 = vadd.f32 %v531_v41, %v356_v4  ;;  %v545_v44 = vadd.f32 %v511_v42, %v370_v35  ;;  %vm1502_vm7 = vcmp.ne.s32.totalorder %v93_v2, 15 }
 0x131   :  { %vm1497_vm6 = vcmp.ne.s32.totalorder %v79_v60, 15  ;;  %v1246_v60 = vld [vmem:[#allocation7 + $0xd0] sm:$0xff]  }
 0x134   :  { %v468_v45 = vpop.f32.mrb[8].mxu0 }
 0x135   :  { %v470_v46 = vpop.f32.mrb[9].mxu0  ;;  %v555_v49 = vrot.slane %v468_v45, 1 }
 0x136   :  { %v472_v48 = vpop.f32.mrb[10].mxu0  ;;  %v558_v54 = vrot.slane %v470_v46, 1 }
 0x137   :  { %v556_v50 = vrot.slane %v472_v48, 1  ;;  %v474_v52 = vpop.f32.mrb[11].mxu0 }
 0x138   :  { %v559_v56 = vrot.slane %v474_v52, 1  ;;  %v1239_v52 = vld [vmem:[#allocation7 + $0x98] sm:$0xff]  }
 0x139   :  { %v557_v59 = vsel %vm554_vm5, %v555_v49, %v556_v50 }
 0x13a   :  { %v597_v61 = vadd.f32 %v557_v59, %v538_v40  ;;  %v560_v62 = vsel %vm554_vm5, %v558_v54, %v559_v56  ;;  %v1245_v59 = vld [vmem:[#allocation7 + $0xc8] sm:$0xff]  }
 0x13b   :  { %v598_v1 = vadd.f32 %v560_v62, %v539_v43 }
 0x13c   :  { %v478_v4 = vpop.f32.mrb[12].mxu0  ;;  %v617_v58 = vadd.f32 %v610_v63, %v597_v61 }
 0x13d   :  { %v561_v6 = vrot.slane %v478_v4, 1  ;;  %v480_v7 = vpop.f32.mrb[13].mxu0  ;;  %v618_v16 = vadd.f32 %v614_v3, %v598_v1 }
 0x13e   :  { %v563_v8 = vrot.slane %v480_v7, 1  ;;  %v482_v9 = vpop.f32.mrb[14].mxu0  ;;  %v625_v34 = vmax.f32 %v617_v58, 0.0 }
 0x13f   :  { %v562_v10 = vsel %vm554_vm5, %v556_v50, %v561_v6  ;;  %v565_v14 = vrot.slane %v482_v9, 1  ;;  %v484_v15 = vpop.f32.mrb[15].mxu0  ;;  %v626_v43 = vmax.f32 %v618_v16, 0.0 }
 0x140   :  { %v591_v17 = vsel %vm1497_vm6, %v562_v10, 0.0  ;;  %v564_v19 = vsel %vm554_vm5, %v559_v56, %v563_v8  ;;  %v567_v20 = vrot.slane %v484_v15, 1  ;;  %v1243_v56 = vld [vmem:[#allocation7 + $0xb8] sm:$0xff]  }
 0x141   :  { %v599_v21 = vadd.f32 %v591_v17, %v1460_v11  ;;  %v592_v23 = vsel %vm1497_vm6, %v564_v19, 0.0  ;;  %v566_v24 = vsel %vm554_vm5, %v561_v6, %v565_v14  ;;  %v579_v25 = vsel %vm554_vm5, %v565_v14, %v555_v49 }
 0x142   :  { %v600_v26 = vadd.f32 %v592_v23, %v1463_v13  ;;  %v595_v27 = vsel %vm1502_vm7, %v579_v25, 0.0  ;;  %v601_v28 = vadd.f32 %v566_v24, %v542_v32  ;;  %v568_v29 = vsel %vm554_vm5, %v563_v8, %v567_v20 }
 0x143   :  { %v619_v30 = vadd.f32 %v610_v63, %v599_v21  ;;  %v603_v31 = vadd.f32 %v595_v27, %v544_v39  ;;  %v580_v33 = vsel %vm554_vm5, %v567_v20, %v558_v54  ;;  %v602_v11 = vadd.f32 %v568_v29, %v543_v38  ;;  %v1238_v38 = vld [vmem:[#allocation7 + $0x90] sm:$0xff]   ;;  %v1241_v54 = vld [vmem:[#allocation7 + $0xa8] sm:$0xff]  }
 0x144   :  { %v620_v35 = vadd.f32 %v614_v3, %v600_v26  ;;  %v596_v36 = vsel %vm1502_vm7, %v580_v33, 0.0  ;;  %v621_v37 = vadd.f32 %v610_v63, %v601_v28 }
 0x145   :  { %v627_v40 = vmax.f32 %v619_v30, 0.0  ;;  %v604_v41 = vadd.f32 %v596_v36, %v545_v44  ;;  %v622_v13 = vadd.f32 %v614_v3, %v602_v11  ;;  %v623_v42 = vadd.f32 %v610_v63, %v603_v31 }
 0x146   :  { %v628_v45 = vmax.f32 %v620_v35, 0.0  ;;  %v629_v32 = vmax.f32 %v621_v37, 0.0 }
 0x147   :  { %v633_v46 = vpack.c.bf16 %v627_v40, %v625_v34  ;;  %v624_v47 = vadd.f32 %v614_v3, %v604_v41  ;;  %v630_v39 = vmax.f32 %v622_v13, 0.0  ;;  %v631_v48 = vmax.f32 %v623_v42, 0.0 }
 0x148   :  { %v634_v49 = vpack.c.bf16 %v628_v45, %v626_v43 }
 0x149   :  { %v632_v50 = vmax.f32 %v624_v47, 0.0  ;;  %v635_v51 = vpack.c.bf16 %v631_v48, %v629_v32 }
 0x14a   :  { %1142 = vmatprep.mubr.msk.bf16.mxu1 %vm709_vm8, %v634_v49  ;;  %1153 = vmatprep.mubr.msk.bf16.mxu0 %vm709_vm8, %v634_v49 }
 0x14b   :  { %749 = vmatmul.mubr.bf16.vlgmr.msra.gmra.mrb[8].mxu1 %v633_v46  ;;  %871 = vmatmul.mubr.bf16.vlgmr.msra.gmra.mrb[16].mxu0 %v633_v46  ;;  %v636_v44 = vpack.c.bf16 %v632_v50, %v630_v39 }
 0x14c   :  { %961 = vmatpush1.bf16.msra.mxu1 %v1238_v38 }
 0x14d   :  { %1143 = vmatprep.mubr.msk.bf16.mxu1 %vm709_vm8, %v636_v44  ;;  %1154 = vmatprep.mubr.msk.bf16.mxu0 %vm709_vm8, %v636_v44 }
 0x14e   :  { %962 = vmatprep.subr.bf16.mxu1 %v1348_v0 }
 0x150   :  { %963 = vmatpush1.bf16.msra.mxu1 %v1239_v52 }
 0x151   :  { %964 = vmatprep.subr.bf16.mxu1 %v1348_v0 }
 0x153   :  { %757 = vmatmul.mubr.bf16.gmra.mrb[12].mxu1 %v635_v51  ;;  %879 = vmatmul.mubr.bf16.gmra.mrb[20].mxu0 %v635_v51 }
 0x154   :  { %965 = vmatpush1.bf16.msra.mxu1 %v1240_v53  ;;  %1164 = vmatprep.mubr.msk.bf16.mxu1 %vm709_vm8, %v634_v49 }
 0x155   :  { %966 = vmatprep.subr.bf16.mxu1 %v1348_v0 }
 0x158   :  { %967 = vmatpush1.bf16.msra.mxu1 %v1241_v54 }
 0x159   :  { %968 = vmatprep.subr.bf16.mxu1 %v1348_v0 }
 0x15c   :  { %969 = vmatpush1.bf16.msra.mxu1 %v1242_v55 }
 0x15d   :  { %970 = vmatprep.subr.bf16.mxu1 %v1348_v0 }
 0x160   :  { %971 = vmatpush1.bf16.msra.mxu1 %v1243_v56 }
 0x161   :  { %972 = vmatprep.subr.bf16.mxu1 %v1348_v0 }
 0x164   :  { %973 = vmatpush1.bf16.msra.mxu1 %v1244_v57 }
 0x165   :  { %974 = vmatprep.subr.bf16.mxu1 %v1348_v0 }
 0x168   :  { %975 = vmatpush1.bf16.msra.mxu1 %v1245_v59 }
 0x169   :  { %976 = vmatprep.subr.bf16.mxu1 %v1348_v0 }
 0x16c   :  { %977 = vmatpush1.bf16.msra.mxu1 %v1246_v60 }
 0x16f   :  { %993 = vmatmul.mubr.bf16.vlgmr.msra.gmra.mrb[16].mxu1 %v633_v46 }
 0x170   :  { %1165 = vmatprep.mubr.msk.bf16.mxu1 %vm709_vm8, %v636_v44 }
 0x177   :  { %1001 = vmatmul.mubr.bf16.gmra.mrb[20].mxu1 %v635_v51 }
 0x21e   :  { %v750_v61 = vpop.f32.mrb[8].mxu1  ;;  %v872_v62 = vpop.f32.mrb[16].mxu0 }
 0x21f   :  { %v752_v63 = vpop.f32.mrb[9].mxu1  ;;  %v874_v1 = vpop.f32.mrb[17].mxu0  ;;  %v1015_v4 = vrot.slane %v750_v61, 7 }
 0x220   :  { %v753_v2 = vpop.f32.mrb[10].mxu1  ;;  %v875_v3 = vpop.f32.mrb[18].mxu0 }
 0x221   :  { %v1016_v6 = vrot.slane %v753_v2, 7  ;;  %v755_v7 = vpop.f32.mrb[11].mxu1  ;;  %v877_v8 = vpop.f32.mrb[19].mxu0 }
 0x223   :  { %v1017_v9 = vsel %vm499_vm2, %v1015_v4, %v1016_v6 }
 0x224   :  { %v1031_v58 = vadd.f32 %v1017_v9, %v875_v3 }
 0x226   :  { %v758_v10 = vpop.f32.mrb[12].mxu1  ;;  %v880_v0 = vpop.f32.mrb[20].mxu0 }
 0x227   :  { %v1018_v14 = vrot.slane %v758_v10, 7  ;;  %v760_v15 = vpop.f32.mrb[13].mxu1  ;;  %v882_v16 = vpop.f32.mrb[21].mxu0 }
 0x228   :  { %v761_v17 = vpop.f32.mrb[14].mxu1  ;;  %v883_v19 = vpop.f32.mrb[22].mxu0 }
 0x229   :  { %v1019_v20 = vsel %vm499_vm2, %v1016_v6, %v1018_v14  ;;  %v1010_v21 = vrot.slane %v761_v17, 7  ;;  %v763_v23 = vpop.f32.mrb[15].mxu1  ;;  %v885_v24 = vpop.f32.mrb[23].mxu0 }
 0x22a   :  { %v1028_v25 = vsel %vm1466_vm3, %v1019_v20, 0.0 }
 0x22b   :  { %v1032_v26 = vadd.f32 %v1028_v25, %v880_v0  ;;  %v1025_v27 = vsel %vm499_vm2, %v1010_v21, %v1015_v4  ;;  %v1020_v28 = vsel %vm499_vm2, %v1018_v14, %v1010_v21 }
 0x22c   :  { %v1026_v29 = vsel %vm1470_vm4, %v1025_v27, 0.0  ;;  %v1033_v30 = vadd.f32 %v1020_v28, %v883_v19 }
 0x22d   :  { %v1030_v31 = vadd.f32 %v1026_v29, %v872_v62 }
 0x242   :  { %v994_v33 = vpop.f32.mrb[16].mxu1 }
 0x243   :  { %v996_v11 = vpop.f32.mrb[17].mxu1  ;;  %v1038_v35 = vrot.slane %v994_v33, 1 }
 0x244   :  { %v997_v34 = vpop.f32.mrb[18].mxu1 }
 0x245   :  { %v1039_v36 = vrot.slane %v997_v34, 1  ;;  %v999_v37 = vpop.f32.mrb[19].mxu1 }
 0x247   :  { %v1040_v40 = vsel %vm554_vm5, %v1038_v35, %v1039_v36 }
 0x248   :  { %v1055_v41 = vadd.f32 %v1040_v40, %v1030_v31 }
 0x24a   :  { %v1066_v13 = vadd.f32 %v1166_v18, %v1055_v41  ;;  %v1002_v42 = vpop.f32.mrb[20].mxu1 }
 0x24b   :  { %v1041_v43 = vrot.slane %v1002_v42, 1  ;;  %v1004_v22 = vpop.f32.mrb[21].mxu1 }
 0x24c   :  { %1070 = vst [vmem:[#allocation8] sm:$0xff] %v1066_v13  ;;  %v1005_v45 = vpop.f32.mrb[22].mxu1 }
 0x24d   :  { %v1042_v32 = vsel %vm554_vm5, %v1039_v36, %v1041_v43  ;;  %v1043_v46 = vrot.slane %v1005_v45, 1  ;;  %v1007_v47 = vpop.f32.mrb[23].mxu1 }
 0x24e   :  { %v1052_v39 = vsel %vm1497_vm6, %v1042_v32, 0.0 }
 0x24f   :  { %v1056_v48 = vadd.f32 %v1052_v39, %v1031_v58  ;;  %v1044_v49 = vsel %vm554_vm5, %v1041_v43, %v1043_v46  ;;  %v1050_v38 = vsel %vm554_vm5, %v1043_v46, %v1038_v35 }
 0x250   :  { %v1054_v50 = vsel %vm1502_vm7, %v1050_v38, 0.0  ;;  %v1057_v51 = vadd.f32 %v1044_v49, %v1032_v26 }
 0x251   :  { %v1067_v44 = vadd.f32 %v1166_v18, %v1056_v48  ;;  %v1058_v52 = vadd.f32 %v1054_v50, %v1033_v30 }
 0x252   :  { %v1068_v53 = vadd.f32 %v1166_v18, %v1057_v51 }
 0x253   :  { %1071 = vst [vmem:[#allocation8 + $0x8] sm:$0xff] %v1067_v44  ;;  %v1069_v54 = vadd.f32 %v1166_v18, %v1058_v52 }
 0x254   :  { %1072 = vst [vmem:[#allocation8 + $0x10] sm:$0xff] %v1068_v53 }
 0x255   :  { %1073 = vst [vmem:[#allocation8 + $0x18] sm:$0xff] %v1069_v54 }
 0x256   :  { %1324 = shalt.err (!%p1321_p0)
}
 0x257   :  { %s1325_s14 = scalar_lea.hbm %s1574_s5, 512 }
 0x258   :  { %p1326_p1 = scmp.ne.s32.totalorder %s1574_s5, %s1325_s14  ;;  %p1329_p2 = scmp.lt.u32.totalorder %s1325_s14, %s1574_s5 }
 0x25a   :  { %p1331_p3 = pnand %p1329_p2, %p1326_p1 }
 0x25c   :  { %1334 = shalt.err (!%p1331_p3)
}
 0x25d   :  { %1085 = dma.vmem_to_hbm [thread:$0]  %s1080_s10, 512, %s1574_s5, [#allocation4], %s1342_s28, %s1342_s28, %s1343_s29  }
 0x25e   :  { %1339 = dma.done.wait [#allocation4], 512  }
 0x25f   :  { %1340 = vsyncadd [#allocation4], 4294966784 }
 0x260   :  { %1089 = vsyncpa [#allocation3], 1 }
 0x261   :  { %1090 = vsyncpa [#allocation6], 1 }
 0x262   :  { %1091 = vsyncpa [#allocation4], 1 }

</bundles_post_ra>
